<compile_context>
chip_gen: v7x
topology: tpu7x:2x2x1
jax: 0.10.0
libtpu: 0.0.40
codegen_flags: <defaults>
</compile_context>

<pallas_src>
import functools

import jax
import jax.numpy as jnp
import numpy as np
from jax import lax
from jax.experimental import pallas as pl
from jax.experimental.pallas import tpu as pltpu

LANE = 128


def _cdiv(a, b):
    return -(-a // b)


def _round_down(x, m):
    return (x // m) * m


def _dice_partial_kernel(x_ref, t_ref, i_ref, y_ref, z_ref, *scratch,
                         n_classes, apply_softmax, tile_rows, group_rows,
                         valid_cols, needs_mask, tiles_per_part, num_tiles,
                         needs_valid_gate):
    """Accumulate per-class partial sums of intersect / y_sum / z_sum.

    x_ref: (1, C, TR, 128) scores        t_ref: (1, TR, 128) int32 labels
    i_ref/y_ref/z_ref: (1, C, G, 128) f32 lane-dense accumulators
    (output blocks revisited across the row-tile grid axis).
    scratch[0] (softmax only): (C, TR, 128) f32 exp cache.
    """
    C, TR, G = n_classes, tile_rows, group_rows
    NG = TR // G
    exp_ref = scratch[0] if apply_softmax else None

    p = pl.program_id(1)
    j = pl.program_id(2)
    g = p * tiles_per_part + j                       # global row-tile index

    @pl.when(j == 0)
    def _():
        i_ref[...] = jnp.zeros_like(i_ref)
        y_ref[...] = jnp.zeros_like(y_ref)
        z_ref[...] = jnp.zeros_like(z_ref)

    def load(c):
        return x_ref[0, c].astype(jnp.float32)       # (TR, 128) f32

    def accumulate(masked):
        tgt = t_ref[0]                               # (TR, 128) int32

        if apply_softmax:
            # Channel softmax as unrolled elementwise VPU/EUP work; exps are
            # cached in VMEM scratch so the per-class pass does not re-exp.
            m = load(0)
            for c in range(1, C):
                m = jnp.maximum(m, load(c))
            den = None
            for c in range(C):
                e = jnp.exp(load(c) - m)
                exp_ref[c] = e
                den = e if den is None else den + e
            inv = pl.reciprocal(den, approx=True)    # EUP slot — ~free

        if masked:
            # Mask padded tail / undefined edge-block fill from the global
            # per-image pixel index (only traced for the last row tile).
            row = lax.broadcasted_iota(jnp.int32, (TR, LANE), 0)
            col = lax.broadcasted_iota(jnp.int32, (TR, LANE), 1)
            flat = g * (TR * LANE) + row * LANE + col
            valid = flat < valid_cols                # (TR, 128) bool

        # TODO(synk): for very large C (>~32) chunk the class axis (C grid
        # axis or inner fori_loop) to bound instruction footprint / keep TR big.
        for c in range(C):
            if apply_softmax:
                sc = exp_ref[c] * inv
            else:
                sc = load(c)
            oh = tgt == c
            if masked:
                # where-selects (not float-mask multiplies): fewer VALU ops
                # and NaN/Inf-safe for undefined edge-block fill data.
                sc = jnp.where(valid, sc, 0.0)
                oh = jnp.logical_and(oh, valid)

            inter = jnp.where(oh, sc, 0.0)
            ones = jnp.where(oh, 1.0, 0.0)

            # Elementwise partial reduction over sublane groups only (plain
            # VPU adds); the cross-lane reduction is deferred to the wrapper.
            i_ref[0, c] += jnp.sum(inter.reshape(NG, G, LANE), axis=0)
            y_ref[0, c] += jnp.sum(ones.reshape(NG, G, LANE), axis=0)
            z_ref[0, c] += jnp.sum((sc * sc).reshape(NG, G, LANE), axis=0)

    is_valid = (g < num_tiles) if needs_valid_gate else None

    if needs_mask:
        is_last = g == num_tiles - 1
        not_last = jnp.logical_not(is_last)
        cond_m = is_last if is_valid is None else jnp.logical_and(is_valid, is_last)
        cond_p = not_last if is_valid is None else jnp.logical_and(is_valid, not_last)
        pl.when(cond_m)(lambda: accumulate(True))
        pl.when(cond_p)(lambda: accumulate(False))
    elif is_valid is not None:
        pl.when(is_valid)(lambda: accumulate(False))
    else:
        accumulate(False)


def _vmem_capacity_bytes():
    try:
        info = pltpu.get_tpu_info()
        cap = getattr(info, "vmem_capacity_bytes", None)
        if cap:
            return int(cap)
    except Exception:
        pass
    return 64 << 20   # conservative fallback (v7x per-TensorCore VMEM)


def dice_loss(inputs, target, weight=None, softmax=False,
              tile_budget_bytes=None):
    """Pallas implementation of DiceLoss.forward.

    inputs: (N, C, H, W) float logits (probabilities if softmax=False)
    target: (N, H, W) integer class labels in [0, C)
    weight: optional per-class weights (length C)
    tile_budget_bytes: optional override of the score-block byte budget
      (testing hook; normally derived from the chip's VMEM capacity).
    """
    N, C, H, W = inputs.shape
    HW = H * W
    itemsize = jnp.dtype(inputs.dtype).itemsize

    # ---- generation-aware tile selection ------------------------------------
    vmem_cap = _vmem_capacity_bytes()
    if tile_budget_bytes is None:
        # ~4 MiB score blocks on 64 MiB-VMEM chips (v7x), ~6 MiB on 128 MiB
        # chips (v5e/v6e); stays well inside scoped VMEM once double-buffered
        # and combined with the exp cache.
        tile_budget_bytes = (4 << 20) if vmem_cap <= (96 << 20) else (6 << 20)

    R = _cdiv(HW, LANE)                       # rows of 128 pixels per image
    sub = 32 if itemsize == 1 else 16         # TR granularity (bf16/fp8-friendly)
    rows_cap = max(sub, _round_down(tile_budget_bytes // (C * LANE * itemsize), sub))
    TR = R if R <= rows_cap else rows_cap     # multiple of `sub`, or whole image
    G = 8 if TR % 8 == 0 else TR              # accumulator sublane rows
    num_tiles = _cdiv(R, TR)
    needs_mask = num_tiles * TR * LANE != HW  # ragged 128-tail or partial block

    # Split the row tiles across a second "parallel" axis so both v7x
    # TensorCores have work when the batch is 1.
    P = 2 if (N == 1 and num_tiles >= 2) else 1
    tiles_per_part = _cdiv(num_tiles, P)
    needs_valid_gate = P * tiles_per_part != num_tiles
    last_tile = num_tiles - 1

    # ---- free contiguous reshape; pad only H*W up to a multiple of 128 ------
    x = inputs.reshape(N, C, HW)
    t = jnp.asarray(target, jnp.int32).reshape(N, HW)
    if R * LANE != HW:
        x = jnp.pad(x, ((0, 0), (0, 0), (0, R * LANE - HW)))
        t = jnp.pad(t, ((0, 0), (0, R * LANE - HW)))
    x = x.reshape(N, C, R, LANE)
    t = t.reshape(N, R, LANE)

    def g_of(p, j):
        g = p * tiles_per_part + j
        if needs_valid_gate:
            g = jnp.minimum(g, last_tile)     # never DMA a fully-OOB block
        return g

    kernel = functools.partial(
        _dice_partial_kernel,
        n_classes=C, apply_softmax=bool(softmax), tile_rows=TR, group_rows=G,
        valid_cols=HW, needs_mask=needs_mask, tiles_per_part=tiles_per_part,
        num_tiles=num_tiles, needs_valid_gate=needs_valid_gate)

    part_shape = jax.ShapeDtypeStruct((N * P, C, G, LANE), jnp.float32)
    part_spec = pl.BlockSpec((1, C, G, LANE), lambda n, p, j: (n * P + p, 0, 0, 0))

    scratch = [pltpu.VMEM((C, TR, LANE), jnp.float32)] if softmax else []

    # VMEM accounting: double-buffered score + label blocks, exp cache,
    # revisited accumulators; explicit limit with headroom below capacity.
    ws = (2 * C * TR * LANE * itemsize + 2 * TR * LANE * 4
          + (C * TR * LANE * 4 if softmax else 0)
          + 2 * 3 * C * G * LANE * 4 + (2 << 20))
    vmem_limit = int(min(vmem_cap - (8 << 20), max(ws, 32 << 20)))

    i_p, y_p, z_p = pl.pallas_call(
        kernel,
        out_shape=(part_shape, part_shape, part_shape),
        grid_spec=pltpu.PrefetchScalarGridSpec(
            num_scalar_prefetch=0,
            grid=(N, P, tiles_per_part),
            in_specs=[
                pl.BlockSpec((1, C, TR, LANE),
                             lambda n, p, j: (n, 0, g_of(p, j), 0)),   # scores
                pl.BlockSpec((1, TR, LANE),
                             lambda n, p, j: (n, g_of(p, j), 0)),      # labels
            ],
            out_specs=(part_spec, part_spec, part_spec),
            scratch_shapes=scratch,
        ),
        compiler_params=pltpu.CompilerParams(
            dimension_semantics=("parallel", "parallel", "arbitrary"),
            vmem_limit_bytes=vmem_limit),
    )(x, t)

    # ---- tiny finalization in plain JAX (O(N*P*C*G*128) elements) -----------
    intersect = jnp.sum(i_p, axis=(0, 2, 3))   # (C,)
    y_sum = jnp.sum(y_p, axis=(0, 2, 3))
    z_sum = jnp.sum(z_p, axis=(0, 2, 3))
    smooth = 1e-5
    dice = 1.0 - (2.0 * intersect + smooth) / (z_sum + y_sum + smooth)
    if weight is None:
        w = jnp.ones((C,), jnp.float32)
    else:
        w = jnp.asarray(weight, jnp.float32).reshape(C)
    return jnp.sum(dice * w) / C


def dice_loss_ref(inputs, target, weight=None, softmax=False):
    """Pure-JAX reference reproducing the PyTorch module exactly."""
    N, C, H, W = inputs.shape
    x = inputs.astype(jnp.float32)
    if softmax:
        x = jax.nn.softmax(x, axis=1)
    onehot = (target[:, None, :, :] == jnp.arange(C)[None, :, None, None]
              ).astype(jnp.float32)
    if weight is None:
        weight = [1.0] * C
    smooth = 1e-5
    loss = 0.0
    for i in range(C):
        s, tg = x[:, i], onehot[:, i]
        inter = jnp.sum(s * tg)
        ysum = jnp.sum(tg * tg)
        zsum = jnp.sum(s * s)
        dice = 1.0 - (2.0 * inter + smooth) / (zsum + ysum + smooth)
        loss = loss + dice * weight[i]
    return loss / C


if __name__ == "__main__":
    key = jax.random.PRNGKey(0)
    ks = jax.random.split(key, 8)

    # Cases 1 & 2: N=2, C=4, 16x16 (H*W multiple of 128: no pad, no mask).
    N, C, H, W = 2, 4, 16, 16
    logits = jax.random.normal(ks[0], (N, C, H, W), dtype=jnp.float32)
    labels = jax.random.randint(ks[1], (N, H, W), 0, C, dtype=jnp.int32)

    out1 = jax.block_until_ready(dice_loss(logits, labels, softmax=False))
    ref1 = dice_loss_ref(logits, labels, softmax=False)
    assert np.allclose(np.asarray(out1), np.asarray(ref1), rtol=1e-5, atol=1e-5), (out1, ref1)

    # Softmax path uses the EUP approximate reciprocal -> slightly looser tol.
    wts = [1.0, 2.0, 0.5, 1.5]
    out2 = jax.block_until_ready(dice_loss(logits, labels, weight=wts, softmax=True))
    ref2 = dice_loss_ref(logits, labels, weight=wts, softmax=True)
    assert np.allclose(np.asarray(out2), np.asarray(ref2), rtol=1e-3, atol=1e-3), (out2, ref2)

    # Case 3: ragged spatial size (13x11): in-kernel tail mask, single tile.
    N2, C2, H2, W2 = 2, 3, 13, 11
    logits2 = jax.random.normal(ks[2], (N2, C2, H2, W2), dtype=jnp.float32)
    labels2 = jax.random.randint(ks[3], (N2, H2, W2), 0, C2, dtype=jnp.int32)
    out3 = jax.block_until_ready(dice_loss(logits2, labels2, softmax=True))
    ref3 = dice_loss_ref(logits2, labels2, softmax=True)
    assert np.allclose(np.asarray(out3), np.asarray(ref3), rtol=1e-3, atol=1e-3), (out3, ref3)

    # Case 4: N=1 with multiple row tiles -> two-part ("both TensorCores")
    # parallel split, even split, no mask.  Forced small tile budget.
    N3, C3, H3, W3 = 1, 3, 64, 64
    logits3 = jax.random.normal(ks[4], (N3, C3, H3, W3), dtype=jnp.float32)
    labels3 = jax.random.randint(ks[5], (N3, H3, W3), 0, C3, dtype=jnp.int32)
    out4 = jax.block_until_ready(
        dice_loss(logits3, labels3, softmax=True,
                  tile_budget_bytes=C3 * 16 * 128 * 4))
    ref4 = dice_loss_ref(logits3, labels3, softmax=True)
    assert np.allclose(np.asarray(out4), np.asarray(ref4), rtol=1e-3, atol=1e-3), (out4, ref4)

    # Case 5: N=1, odd number of row tiles (clamped duplicate tile gated off)
    # + partial last block mask, bf16 scores, non-softmax path.
    N4, C4, H4, W4 = 1, 3, 94, 64            # HW = 6016 -> 47 rows of 128
    logits4 = jax.random.normal(ks[6], (N4, C4, H4, W4),
                                dtype=jnp.float32).astype(jnp.bfloat16)
    labels4 = jax.random.randint(ks[7], (N4, H4, W4), 0, C4, dtype=jnp.int32)
    out5 = jax.block_until_ready(
        dice_loss(logits4, labels4, softmax=False,
                  tile_budget_bytes=C4 * 16 * 128 * 2))
    ref5 = dice_loss_ref(logits4, labels4, softmax=False)
    assert np.allclose(np.asarray(out5), np.asarray(ref5), rtol=1e-5, atol=1e-5), (out5, ref5)

    print("KERNEL_OK")
</pallas_src>

<mosaic_0001>
module attributes {stable_mosaic.version = 11 : i64} {
  func.func @_dice_partial_kernel(%arg0: i32, %arg1: i32, %arg2: i32, %arg3: memref<1x4x2x128xf32, #tpu.memory_space<vmem>>, %arg4: memref<1x2x128xi32, #tpu.memory_space<vmem>>, %arg5: memref<1x4x2x128xf32, #tpu.memory_space<vmem>>, %arg6: memref<1x4x2x128xf32, #tpu.memory_space<vmem>>, %arg7: memref<1x4x2x128xf32, #tpu.memory_space<vmem>>) attributes {dimension_semantics = [#tpu.dimension_semantics<parallel>, #tpu.dimension_semantics<parallel>, #tpu.dimension_semantics<arbitrary>], iteration_bounds = array<i64: 2, 1, 1>, scalar_prefetch = 0 : i64, scratch_operands = 0 : i64, tpu.core_type = #tpu.core_type<tc>, window_params = [{transform_indices = @transform_0, window_bounds = array<i64: 1, 4, 2, 128>}, {transform_indices = @transform_1, window_bounds = array<i64: 1, 2, 128>}, {transform_indices = @transform_2, window_bounds = array<i64: 1, 4, 2, 128>}, {transform_indices = @transform_3, window_bounds = array<i64: 1, 4, 2, 128>}, {transform_indices = @transform_4, window_bounds = array<i64: 1, 4, 2, 128>}]} {
    %c0_i32 = arith.constant 0 : i32
    %0 = arith.cmpi eq, %arg2, %c0_i32 : i32
    %1 = arith.extui %0 : i1 to i32
    %c0_i32_0 = arith.constant 0 : i32
    %2 = arith.cmpi ne, %1, %c0_i32_0 : i32
    scf.if %2 {
      %cst_136 = arith.constant 0.000000e+00 : f32
      %141 = vector.broadcast %cst_136 : f32 to vector<1x4x2x128xf32>
      %c0_137 = arith.constant 0 : index
      %c0_138 = arith.constant 0 : index
      %c0_139 = arith.constant 0 : index
      %c0_140 = arith.constant 0 : index
      %142 = vector.load %arg5[%c0_137, %c0_138, %c0_139, %c0_140] : memref<1x4x2x128xf32, #tpu.memory_space<vmem>>, vector<1x4x2x128xf32>
      tpu.vector_store %arg5[%c0_137, %c0_138, %c0_139, %c0_140], %141 {strides = array<i32>} : memref<1x4x2x128xf32, #tpu.memory_space<vmem>>, vector<1x4x2x128xf32>,
      %cst_141 = arith.constant 0.000000e+00 : f32
      %143 = vector.broadcast %cst_141 : f32 to vector<1x4x2x128xf32>
      %c0_142 = arith.constant 0 : index
      %c0_143 = arith.constant 0 : index
      %c0_144 = arith.constant 0 : index
      %c0_145 = arith.constant 0 : index
      %144 = vector.load %arg6[%c0_142, %c0_143, %c0_144, %c0_145] : memref<1x4x2x128xf32, #tpu.memory_space<vmem>>, vector<1x4x2x128xf32>
      tpu.vector_store %arg6[%c0_142, %c0_143, %c0_144, %c0_145], %143 {strides = array<i32>} : memref<1x4x2x128xf32, #tpu.memory_space<vmem>>, vector<1x4x2x128xf32>,
      %cst_146 = arith.constant 0.000000e+00 : f32
      %145 = vector.broadcast %cst_146 : f32 to vector<1x4x2x128xf32>
      %c0_147 = arith.constant 0 : index
      %c0_148 = arith.constant 0 : index
      %c0_149 = arith.constant 0 : index
      %c0_150 = arith.constant 0 : index
      %146 = vector.load %arg7[%c0_147, %c0_148, %c0_149, %c0_150] : memref<1x4x2x128xf32, #tpu.memory_space<vmem>>, vector<1x4x2x128xf32>
      tpu.vector_store %arg7[%c0_147, %c0_148, %c0_149, %c0_150], %145 {strides = array<i32>} : memref<1x4x2x128xf32, #tpu.memory_space<vmem>>, vector<1x4x2x128xf32>,
    } else {
    }
    %c0 = arith.constant 0 : index
    %c0_1 = arith.constant 0 : index
    %c0_2 = arith.constant 0 : index
    %3 = vector.load %arg4[%c0, %c0_1, %c0_2] : memref<1x2x128xi32, #tpu.memory_space<vmem>>, vector<1x2x128xi32>
    %4 = vector.shape_cast %3 : vector<1x2x128xi32> to vector<2x128xi32>
    %c0_3 = arith.constant 0 : index
    %c0_4 = arith.constant 0 : index
    %c0_5 = arith.constant 0 : index
    %c0_6 = arith.constant 0 : index
    %5 = vector.load %arg3[%c0_3, %c0_4, %c0_5, %c0_6] : memref<1x4x2x128xf32, #tpu.memory_space<vmem>>, vector<1x1x2x128xf32>
    %6 = vector.shape_cast %5 : vector<1x1x2x128xf32> to vector<2x128xf32>
    %c0_i32_7 = arith.constant 0 : i32
    %7 = vector.broadcast %c0_i32_7 : i32 to vector<2x128xi32>
    %8 = arith.cmpi eq, %4, %7 : vector<2x128xi32>
    %cst = arith.constant 0.000000e+00 : f32
    %9 = vector.broadcast %cst : f32 to vector<2x128xf32>
    %10 = arith.select %8, %6, %9 : vector<2x128xi1>, vector<2x128xf32>
    %cst_8 = arith.constant 1.000000e+00 : f32
    %cst_9 = arith.constant 0.000000e+00 : f32
    %11 = vector.broadcast %cst_8 : f32 to vector<2x128xf32>
    %12 = vector.broadcast %cst_9 : f32 to vector<2x128xf32>
    %13 = arith.select %8, %11, %12 : vector<2x128xi1>, vector<2x128xf32>
    %c0_10 = arith.constant 0 : index
    %c0_11 = arith.constant 0 : index
    %c0_12 = arith.constant 0 : index
    %c0_13 = arith.constant 0 : index
    %14 = vector.load %arg5[%c0_10, %c0_11, %c0_12, %c0_13] : memref<1x4x2x128xf32, #tpu.memory_space<vmem>>, vector<1x1x2x128xf32>
    %15 = vector.shape_cast %14 : vector<1x1x2x128xf32> to vector<2x128xf32>
    %16 = vector.shape_cast %10 : vector<2x128xf32> to vector<1x2x128xf32>
    %cst_14 = arith.constant dense<0.000000e+00> : vector<2x128xf32>
    %17 = vector.multi_reduction <add>, %16, %cst_14 [0] : vector<1x2x128xf32> to vector<2x128xf32>
    %18 = arith.addf %15, %17 : vector<2x128xf32>
    %c0_15 = arith.constant 0 : index
    %c0_16 = arith.constant 0 : index
    %c0_17 = arith.constant 0 : index
    %c0_18 = arith.constant 0 : index
    %19 = vector.load %arg5[%c0_15, %c0_16, %c0_17, %c0_18] : memref<1x4x2x128xf32, #tpu.memory_space<vmem>>, vector<1x1x2x128xf32>
    %20 = vector.shape_cast %19 : vector<1x1x2x128xf32> to vector<2x128xf32>
    %21 = vector.shape_cast %18 : vector<2x128xf32> to vector<1x1x2x128xf32>
    tpu.vector_store %arg5[%c0_15, %c0_16, %c0_17, %c0_18], %21 {strides = array<i32>} : memref<1x4x2x128xf32, #tpu.memory_space<vmem>>, vector<1x1x2x128xf32>,
    %c0_19 = arith.constant 0 : index
    %c0_20 = arith.constant 0 : index
    %c0_21 = arith.constant 0 : index
    %c0_22 = arith.constant 0 : index
    %22 = vector.load %arg6[%c0_19, %c0_20, %c0_21, %c0_22] : memref<1x4x2x128xf32, #tpu.memory_space<vmem>>, vector<1x1x2x128xf32>
    %23 = vector.shape_cast %22 : vector<1x1x2x128xf32> to vector<2x128xf32>
    %24 = vector.shape_cast %13 : vector<2x128xf32> to vector<1x2x128xf32>
    %cst_23 = arith.constant dense<0.000000e+00> : vector<2x128xf32>
    %25 = vector.multi_reduction <add>, %24, %cst_23 [0] : vector<1x2x128xf32> to vector<2x128xf32>
    %26 = arith.addf %23, %25 : vector<2x128xf32>
    %c0_24 = arith.constant 0 : index
    %c0_25 = arith.constant 0 : index
    %c0_26 = arith.constant 0 : index
    %c0_27 = arith.constant 0 : index
    %27 = vector.load %arg6[%c0_24, %c0_25, %c0_26, %c0_27] : memref<1x4x2x128xf32, #tpu.memory_space<vmem>>, vector<1x1x2x128xf32>
    %28 = vector.shape_cast %27 : vector<1x1x2x128xf32> to vector<2x128xf32>
    %29 = vector.shape_cast %26 : vector<2x128xf32> to vector<1x1x2x128xf32>
    tpu.vector_store %arg6[%c0_24, %c0_25, %c0_26, %c0_27], %29 {strides = array<i32>} : memref<1x4x2x128xf32, #tpu.memory_space<vmem>>, vector<1x1x2x128xf32>,
    %c0_28 = arith.constant 0 : index
    %c0_29 = arith.constant 0 : index
    %c0_30 = arith.constant 0 : index
    %c0_31 = arith.constant 0 : index
    %30 = vector.load %arg7[%c0_28, %c0_29, %c0_30, %c0_31] : memref<1x4x2x128xf32, #tpu.memory_space<vmem>>, vector<1x1x2x128xf32>
    %31 = vector.shape_cast %30 : vector<1x1x2x128xf32> to vector<2x128xf32>
    %32 = arith.mulf %6, %6 : vector<2x128xf32>
    %33 = vector.shape_cast %32 : vector<2x128xf32> to vector<1x2x128xf32>
    %cst_32 = arith.constant dense<0.000000e+00> : vector<2x128xf32>
    %34 = vector.multi_reduction <add>, %33, %cst_32 [0] : vector<1x2x128xf32> to vector<2x128xf32>
    %35 = arith.addf %31, %34 : vector<2x128xf32>
    %c0_33 = arith.constant 0 : index
    %c0_34 = arith.constant 0 : index
    %c0_35 = arith.constant 0 : index
    %c0_36 = arith.constant 0 : index
    %36 = vector.load %arg7[%c0_33, %c0_34, %c0_35, %c0_36] : memref<1x4x2x128xf32, #tpu.memory_space<vmem>>, vector<1x1x2x128xf32>
    %37 = vector.shape_cast %36 : vector<1x1x2x128xf32> to vector<2x128xf32>
    %38 = vector.shape_cast %35 : vector<2x128xf32> to vector<1x1x2x128xf32>
    tpu.vector_store %arg7[%c0_33, %c0_34, %c0_35, %c0_36], %38 {strides = array<i32>} : memref<1x4x2x128xf32, #tpu.memory_space<vmem>>, vector<1x1x2x128xf32>,
    %c0_37 = arith.constant 0 : index
    %c1 = arith.constant 1 : index
    %c0_38 = arith.constant 0 : index
    %c0_39 = arith.constant 0 : index
    %39 = vector.load %arg3[%c0_37, %c1, %c0_38, %c0_39] : memref<1x4x2x128xf32, #tpu.memory_space<vmem>>, vector<1x1x2x128xf32>
    %40 = vector.shape_cast %39 : vector<1x1x2x128xf32> to vector<2x128xf32>
    %c1_i32 = arith.constant 1 : i32
    %41 = vector.broadcast %c1_i32 : i32 to vector<2x128xi32>
    %42 = arith.cmpi eq, %4, %41 : vector<2x128xi32>
    %cst_40 = arith.constant 0.000000e+00 : f32
    %43 = vector.broadcast %cst_40 : f32 to vector<2x128xf32>
    %44 = arith.select %42, %40, %43 : vector<2x128xi1>, vector<2x128xf32>
    %cst_41 = arith.constant 1.000000e+00 : f32
    %cst_42 = arith.constant 0.000000e+00 : f32
    %45 = vector.broadcast %cst_41 : f32 to vector<2x128xf32>
    %46 = vector.broadcast %cst_42 : f32 to vector<2x128xf32>
    %47 = arith.select %42, %45, %46 : vector<2x128xi1>, vector<2x128xf32>
    %c0_43 = arith.constant 0 : index
    %c1_44 = arith.constant 1 : index
    %c0_45 = arith.constant 0 : index
    %c0_46 = arith.constant 0 : index
    %48 = vector.load %arg5[%c0_43, %c1_44, %c0_45, %c0_46] : memref<1x4x2x128xf32, #tpu.memory_space<vmem>>, vector<1x1x2x128xf32>
    %49 = vector.shape_cast %48 : vector<1x1x2x128xf32> to vector<2x128xf32>
    %50 = vector.shape_cast %44 : vector<2x128xf32> to vector<1x2x128xf32>
    %cst_47 = arith.constant dense<0.000000e+00> : vector<2x128xf32>
    %51 = vector.multi_reduction <add>, %50, %cst_47 [0] : vector<1x2x128xf32> to vector<2x128xf32>
    %52 = arith.addf %49, %51 : vector<2x128xf32>
    %c0_48 = arith.constant 0 : index
    %c1_49 = arith.constant 1 : index
    %c0_50 = arith.constant 0 : index
    %c0_51 = arith.constant 0 : index
    %53 = vector.load %arg5[%c0_48, %c1_49, %c0_50, %c0_51] : memref<1x4x2x128xf32, #tpu.memory_space<vmem>>, vector<1x1x2x128xf32>
    %54 = vector.shape_cast %53 : vector<1x1x2x128xf32> to vector<2x128xf32>
    %55 = vector.shape_cast %52 : vector<2x128xf32> to vector<1x1x2x128xf32>
    tpu.vector_store %arg5[%c0_48, %c1_49, %c0_50, %c0_51], %55 {strides = array<i32>} : memref<1x4x2x128xf32, #tpu.memory_space<vmem>>, vector<1x1x2x128xf32>,
    %c0_52 = arith.constant 0 : index
    %c1_53 = arith.constant 1 : index
    %c0_54 = arith.constant 0 : index
    %c0_55 = arith.constant 0 : index
    %56 = vector.load %arg6[%c0_52, %c1_53, %c0_54, %c0_55] : memref<1x4x2x128xf32, #tpu.memory_space<vmem>>, vector<1x1x2x128xf32>
    %57 = vector.shape_cast %56 : vector<1x1x2x128xf32> to vector<2x128xf32>
    %58 = vector.shape_cast %47 : vector<2x128xf32> to vector<1x2x128xf32>
    %cst_56 = arith.constant dense<0.000000e+00> : vector<2x128xf32>
    %59 = vector.multi_reduction <add>, %58, %cst_56 [0] : vector<1x2x128xf32> to vector<2x128xf32>
    %60 = arith.addf %57, %59 : vector<2x128xf32>
    %c0_57 = arith.constant 0 : index
    %c1_58 = arith.constant 1 : index
    %c0_59 = arith.constant 0 : index
    %c0_60 = arith.constant 0 : index
    %61 = vector.load %arg6[%c0_57, %c1_58, %c0_59, %c0_60] : memref<1x4x2x128xf32, #tpu.memory_space<vmem>>, vector<1x1x2x128xf32>
    %62 = vector.shape_cast %61 : vector<1x1x2x128xf32> to vector<2x128xf32>
    %63 = vector.shape_cast %60 : vector<2x128xf32> to vector<1x1x2x128xf32>
    tpu.vector_store %arg6[%c0_57, %c1_58, %c0_59, %c0_60], %63 {strides = array<i32>} : memref<1x4x2x128xf32, #tpu.memory_space<vmem>>, vector<1x1x2x128xf32>,
    %c0_61 = arith.constant 0 : index
    %c1_62 = arith.constant 1 : index
    %c0_63 = arith.constant 0 : index
    %c0_64 = arith.constant 0 : index
    %64 = vector.load %arg7[%c0_61, %c1_62, %c0_63, %c0_64] : memref<1x4x2x128xf32, #tpu.memory_space<vmem>>, vector<1x1x2x128xf32>
    %65 = vector.shape_cast %64 : vector<1x1x2x128xf32> to vector<2x128xf32>
    %66 = arith.mulf %40, %40 : vector<2x128xf32>
    %67 = vector.shape_cast %66 : vector<2x128xf32> to vector<1x2x128xf32>
    %cst_65 = arith.constant dense<0.000000e+00> : vector<2x128xf32>
    %68 = vector.multi_reduction <add>, %67, %cst_65 [0] : vector<1x2x128xf32> to vector<2x128xf32>
    %69 = arith.addf %65, %68 : vector<2x128xf32>
    %c0_66 = arith.constant 0 : index
    %c1_67 = arith.constant 1 : index
    %c0_68 = arith.constant 0 : index
    %c0_69 = arith.constant 0 : index
    %70 = vector.load %arg7[%c0_66, %c1_67, %c0_68, %c0_69] : memref<1x4x2x128xf32, #tpu.memory_space<vmem>>, vector<1x1x2x128xf32>
    %71 = vector.shape_cast %70 : vector<1x1x2x128xf32> to vector<2x128xf32>
    %72 = vector.shape_cast %69 : vector<2x128xf32> to vector<1x1x2x128xf32>
    tpu.vector_store %arg7[%c0_66, %c1_67, %c0_68, %c0_69], %72 {strides = array<i32>} : memref<1x4x2x128xf32, #tpu.memory_space<vmem>>, vector<1x1x2x128xf32>,
    %c0_70 = arith.constant 0 : index
    %c2 = arith.constant 2 : index
    %c0_71 = arith.constant 0 : index
    %c0_72 = arith.constant 0 : index
    %73 = vector.load %arg3[%c0_70, %c2, %c0_71, %c0_72] : memref<1x4x2x128xf32, #tpu.memory_space<vmem>>, vector<1x1x2x128xf32>
    %74 = vector.shape_cast %73 : vector<1x1x2x128xf32> to vector<2x128xf32>
    %c2_i32 = arith.constant 2 : i32
    %75 = vector.broadcast %c2_i32 : i32 to vector<2x128xi32>
    %76 = arith.cmpi eq, %4, %75 : vector<2x128xi32>
    %cst_73 = arith.constant 0.000000e+00 : f32
    %77 = vector.broadcast %cst_73 : f32 to vector<2x128xf32>
    %78 = arith.select %76, %74, %77 : vector<2x128xi1>, vector<2x128xf32>
    %cst_74 = arith.constant 1.000000e+00 : f32
    %cst_75 = arith.constant 0.000000e+00 : f32
    %79 = vector.broadcast %cst_74 : f32 to vector<2x128xf32>
    %80 = vector.broadcast %cst_75 : f32 to vector<2x128xf32>
    %81 = arith.select %76, %79, %80 : vector<2x128xi1>, vector<2x128xf32>
    %c0_76 = arith.constant 0 : index
    %c2_77 = arith.constant 2 : index
    %c0_78 = arith.constant 0 : index
    %c0_79 = arith.constant 0 : index
    %82 = vector.load %arg5[%c0_76, %c2_77, %c0_78, %c0_79] : memref<1x4x2x128xf32, #tpu.memory_space<vmem>>, vector<1x1x2x128xf32>
    %83 = vector.shape_cast %82 : vector<1x1x2x128xf32> to vector<2x128xf32>
    %84 = vector.shape_cast %78 : vector<2x128xf32> to vector<1x2x128xf32>
    %cst_80 = arith.constant dense<0.000000e+00> : vector<2x128xf32>
    %85 = vector.multi_reduction <add>, %84, %cst_80 [0] : vector<1x2x128xf32> to vector<2x128xf32>
    %86 = arith.addf %83, %85 : vector<2x128xf32>
    %c0_81 = arith.constant 0 : index
    %c2_82 = arith.constant 2 : index
    %c0_83 = arith.constant 0 : index
    %c0_84 = arith.constant 0 : index
    %87 = vector.load %arg5[%c0_81, %c2_82, %c0_83, %c0_84] : memref<1x4x2x128xf32, #tpu.memory_space<vmem>>, vector<1x1x2x128xf32>
    %88 = vector.shape_cast %87 : vector<1x1x2x128xf32> to vector<2x128xf32>
    %89 = vector.shape_cast %86 : vector<2x128xf32> to vector<1x1x2x128xf32>
    tpu.vector_store %arg5[%c0_81, %c2_82, %c0_83, %c0_84], %89 {strides = array<i32>} : memref<1x4x2x128xf32, #tpu.memory_space<vmem>>, vector<1x1x2x128xf32>,
    %c0_85 = arith.constant 0 : index
    %c2_86 = arith.constant 2 : index
    %c0_87 = arith.constant 0 : index
    %c0_88 = arith.constant 0 : index
    %90 = vector.load %arg6[%c0_85, %c2_86, %c0_87, %c0_88] : memref<1x4x2x128xf32, #tpu.memory_space<vmem>>, vector<1x1x2x128xf32>
    %91 = vector.shape_cast %90 : vector<1x1x2x128xf32> to vector<2x128xf32>
    %92 = vector.shape_cast %81 : vector<2x128xf32> to vector<1x2x128xf32>
    %cst_89 = arith.constant dense<0.000000e+00> : vector<2x128xf32>
    %93 = vector.multi_reduction <add>, %92, %cst_89 [0] : vector<1x2x128xf32> to vector<2x128xf32>
    %94 = arith.addf %91, %93 : vector<2x128xf32>
    %c0_90 = arith.constant 0 : index
    %c2_91 = arith.constant 2 : index
    %c0_92 = arith.constant 0 : index
    %c0_93 = arith.constant 0 : index
    %95 = vector.load %arg6[%c0_90, %c2_91, %c0_92, %c0_93] : memref<1x4x2x128xf32, #tpu.memory_space<vmem>>, vector<1x1x2x128xf32>
    %96 = vector.shape_cast %95 : vector<1x1x2x128xf32> to vector<2x128xf32>
    %97 = vector.shape_cast %94 : vector<2x128xf32> to vector<1x1x2x128xf32>
    tpu.vector_store %arg6[%c0_90, %c2_91, %c0_92, %c0_93], %97 {strides = array<i32>} : memref<1x4x2x128xf32, #tpu.memory_space<vmem>>, vector<1x1x2x128xf32>,
    %c0_94 = arith.constant 0 : index
    %c2_95 = arith.constant 2 : index
    %c0_96 = arith.constant 0 : index
    %c0_97 = arith.constant 0 : index
    %98 = vector.load %arg7[%c0_94, %c2_95, %c0_96, %c0_97] : memref<1x4x2x128xf32, #tpu.memory_space<vmem>>, vector<1x1x2x128xf32>
    %99 = vector.shape_cast %98 : vector<1x1x2x128xf32> to vector<2x128xf32>
    %100 = arith.mulf %74, %74 : vector<2x128xf32>
    %101 = vector.shape_cast %100 : vector<2x128xf32> to vector<1x2x128xf32>
    %cst_98 = arith.constant dense<0.000000e+00> : vector<2x128xf32>
    %102 = vector.multi_reduction <add>, %101, %cst_98 [0] : vector<1x2x128xf32> to vector<2x128xf32>
    %103 = arith.addf %99, %102 : vector<2x128xf32>
    %c0_99 = arith.constant 0 : index
    %c2_100 = arith.constant 2 : index
    %c0_101 = arith.constant 0 : index
    %c0_102 = arith.constant 0 : index
    %104 = vector.load %arg7[%c0_99, %c2_100, %c0_101, %c0_102] : memref<1x4x2x128xf32, #tpu.memory_space<vmem>>, vector<1x1x2x128xf32>
    %105 = vector.shape_cast %104 : vector<1x1x2x128xf32> to vector<2x128xf32>
    %106 = vector.shape_cast %103 : vector<2x128xf32> to vector<1x1x2x128xf32>
    tpu.vector_store %arg7[%c0_99, %c2_100, %c0_101, %c0_102], %106 {strides = array<i32>} : memref<1x4x2x128xf32, #tpu.memory_space<vmem>>, vector<1x1x2x128xf32>,
    %c0_103 = arith.constant 0 : index
    %c3 = arith.constant 3 : index
    %c0_104 = arith.constant 0 : index
    %c0_105 = arith.constant 0 : index
    %107 = vector.load %arg3[%c0_103, %c3, %c0_104, %c0_105] : memref<1x4x2x128xf32, #tpu.memory_space<vmem>>, vector<1x1x2x128xf32>
    %108 = vector.shape_cast %107 : vector<1x1x2x128xf32> to vector<2x128xf32>
    %c3_i32 = arith.constant 3 : i32
    %109 = vector.broadcast %c3_i32 : i32 to vector<2x128xi32>
    %110 = arith.cmpi eq, %4, %109 : vector<2x128xi32>
    %cst_106 = arith.constant 0.000000e+00 : f32
    %111 = vector.broadcast %cst_106 : f32 to vector<2x128xf32>
    %112 = arith.select %110, %108, %111 : vector<2x128xi1>, vector<2x128xf32>
    %cst_107 = arith.constant 1.000000e+00 : f32
    %cst_108 = arith.constant 0.000000e+00 : f32
    %113 = vector.broadcast %cst_107 : f32 to vector<2x128xf32>
    %114 = vector.broadcast %cst_108 : f32 to vector<2x128xf32>
    %115 = arith.select %110, %113, %114 : vector<2x128xi1>, vector<2x128xf32>
    %c0_109 = arith.constant 0 : index
    %c3_110 = arith.constant 3 : index
    %c0_111 = arith.constant 0 : index
    %c0_112 = arith.constant 0 : index
    %116 = vector.load %arg5[%c0_109, %c3_110, %c0_111, %c0_112] : memref<1x4x2x128xf32, #tpu.memory_space<vmem>>, vector<1x1x2x128xf32>
    %117 = vector.shape_cast %116 : vector<1x1x2x128xf32> to vector<2x128xf32>
    %118 = vector.shape_cast %112 : vector<2x128xf32> to vector<1x2x128xf32>
    %cst_113 = arith.constant dense<0.000000e+00> : vector<2x128xf32>
    %119 = vector.multi_reduction <add>, %118, %cst_113 [0] : vector<1x2x128xf32> to vector<2x128xf32>
    %120 = arith.addf %117, %119 : vector<2x128xf32>
    %c0_114 = arith.constant 0 : index
    %c3_115 = arith.constant 3 : index
    %c0_116 = arith.constant 0 : index
    %c0_117 = arith.constant 0 : index
    %121 = vector.load %arg5[%c0_114, %c3_115, %c0_116, %c0_117] : memref<1x4x2x128xf32, #tpu.memory_space<vmem>>, vector<1x1x2x128xf32>
    %122 = vector.shape_cast %121 : vector<1x1x2x128xf32> to vector<2x128xf32>
    %123 = vector.shape_cast %120 : vector<2x128xf32> to vector<1x1x2x128xf32>
    tpu.vector_store %arg5[%c0_114, %c3_115, %c0_116, %c0_117], %123 {strides = array<i32>} : memref<1x4x2x128xf32, #tpu.memory_space<vmem>>, vector<1x1x2x128xf32>,
    %c0_118 = arith.constant 0 : index
    %c3_119 = arith.constant 3 : index
    %c0_120 = arith.constant 0 : index
    %c0_121 = arith.constant 0 : index
    %124 = vector.load %arg6[%c0_118, %c3_119, %c0_120, %c0_121] : memref<1x4x2x128xf32, #tpu.memory_space<vmem>>, vector<1x1x2x128xf32>
    %125 = vector.shape_cast %124 : vector<1x1x2x128xf32> to vector<2x128xf32>
    %126 = vector.shape_cast %115 : vector<2x128xf32> to vector<1x2x128xf32>
    %cst_122 = arith.constant dense<0.000000e+00> : vector<2x128xf32>
    %127 = vector.multi_reduction <add>, %126, %cst_122 [0] : vector<1x2x128xf32> to vector<2x128xf32>
    %128 = arith.addf %125, %127 : vector<2x128xf32>
    %c0_123 = arith.constant 0 : index
    %c3_124 = arith.constant 3 : index
    %c0_125 = arith.constant 0 : index
    %c0_126 = arith.constant 0 : index
    %129 = vector.load %arg6[%c0_123, %c3_124, %c0_125, %c0_126] : memref<1x4x2x128xf32, #tpu.memory_space<vmem>>, vector<1x1x2x128xf32>
    %130 = vector.shape_cast %129 : vector<1x1x2x128xf32> to vector<2x128xf32>
    %131 = vector.shape_cast %128 : vector<2x128xf32> to vector<1x1x2x128xf32>
    tpu.vector_store %arg6[%c0_123, %c3_124, %c0_125, %c0_126], %131 {strides = array<i32>} : memref<1x4x2x128xf32, #tpu.memory_space<vmem>>, vector<1x1x2x128xf32>,
    %c0_127 = arith.constant 0 : index
    %c3_128 = arith.constant 3 : index
    %c0_129 = arith.constant 0 : index
    %c0_130 = arith.constant 0 : index
    %132 = vector.load %arg7[%c0_127, %c3_128, %c0_129, %c0_130] : memref<1x4x2x128xf32, #tpu.memory_space<vmem>>, vector<1x1x2x128xf32>
    %133 = vector.shape_cast %132 : vector<1x1x2x128xf32> to vector<2x128xf32>
    %134 = arith.mulf %108, %108 : vector<2x128xf32>
    %135 = vector.shape_cast %134 : vector<2x128xf32> to vector<1x2x128xf32>
    %cst_131 = arith.constant dense<0.000000e+00> : vector<2x128xf32>
    %136 = vector.multi_reduction <add>, %135, %cst_131 [0] : vector<1x2x128xf32> to vector<2x128xf32>
    %137 = arith.addf %133, %136 : vector<2x128xf32>
    %c0_132 = arith.constant 0 : index
    %c3_133 = arith.constant 3 : index
    %c0_134 = arith.constant 0 : index
    %c0_135 = arith.constant 0 : index
    %138 = vector.load %arg7[%c0_132, %c3_133, %c0_134, %c0_135] : memref<1x4x2x128xf32, #tpu.memory_space<vmem>>, vector<1x1x2x128xf32>
    %139 = vector.shape_cast %138 : vector<1x1x2x128xf32> to vector<2x128xf32>
    %140 = vector.shape_cast %137 : vector<2x128xf32> to vector<1x1x2x128xf32>
    tpu.vector_store %arg7[%c0_132, %c3_133, %c0_134, %c0_135], %140 {strides = array<i32>} : memref<1x4x2x128xf32, #tpu.memory_space<vmem>>, vector<1x1x2x128xf32>,
    return
  }
  func.func @transform_0(%arg0: i32, %arg1: i32, %arg2: i32) -> (i32, i32, i32, i32) {
    %c1_i32 = arith.constant 1 : i32
    %0 = arith.muli %arg1, %c1_i32 : i32
    %1 = arith.addi %0, %arg2 : i32
    %c0_i32 = arith.constant 0 : i32
    %c0_i32_0 = arith.constant 0 : i32
    %c0_i32_1 = arith.constant 0 : i32
    return %arg0, %c0_i32, %1, %c0_i32_0 : i32, i32, i32, i32
  }
  func.func @transform_1(%arg0: i32, %arg1: i32, %arg2: i32) -> (i32, i32, i32) {
    %c1_i32 = arith.constant 1 : i32
    %0 = arith.muli %arg1, %c1_i32 : i32
    %1 = arith.addi %0, %arg2 : i32
    %c0_i32 = arith.constant 0 : i32
    %c0_i32_0 = arith.constant 0 : i32
    return %arg0, %1, %c0_i32 : i32, i32, i32
  }
  func.func @transform_2(%arg0: i32, %arg1: i32, %arg2: i32) -> (i32, i32, i32, i32) {
    %c1_i32 = arith.constant 1 : i32
    %0 = arith.muli %arg0, %c1_i32 : i32
    %1 = arith.addi %0, %arg1 : i32
    %c0_i32 = arith.constant 0 : i32
    %c0_i32_0 = arith.constant 0 : i32
    %c0_i32_1 = arith.constant 0 : i32
    %c0_i32_2 = arith.constant 0 : i32
    return %1, %c0_i32, %c0_i32_0, %c0_i32_1 : i32, i32, i32, i32
  }
  func.func @transform_3(%arg0: i32, %arg1: i32, %arg2: i32) -> (i32, i32, i32, i32) {
    %c1_i32 = arith.constant 1 : i32
    %0 = arith.muli %arg0, %c1_i32 : i32
    %1 = arith.addi %0, %arg1 : i32
    %c0_i32 = arith.constant 0 : i32
    %c0_i32_0 = arith.constant 0 : i32
    %c0_i32_1 = arith.constant 0 : i32
    %c0_i32_2 = arith.constant 0 : i32
    return %1, %c0_i32, %c0_i32_0, %c0_i32_1 : i32, i32, i32, i32
  }
  func.func @transform_4(%arg0: i32, %arg1: i32, %arg2: i32) -> (i32, i32, i32, i32) {
    %c1_i32 = arith.constant 1 : i32
    %0 = arith.muli %arg0, %c1_i32 : i32
    %1 = arith.addi %0, %arg1 : i32
    %c0_i32 = arith.constant 0 : i32
    %c0_i32_0 = arith.constant 0 : i32
    %c0_i32_1 = arith.constant 0 : i32
    %c0_i32_2 = arith.constant 0 : i32
    return %1, %c0_i32, %c0_i32_0, %c0_i32_1 : i32, i32, i32, i32
  }
}

</mosaic_0001>

<bundles_post_ra>
// kernel: tpu_custom_call.1
= control target key start
LH: loop header
LB: loop body
LE: loop exit
PB: predicated region body
PF: predicated region fallthrough
CT: control target
= control target key end

     0   :  { %s1386_s0 = inlined_call_operand.hbm [shape: f32[2,4,2,128], index: 0, kind: input, shape index: {}]   ;;  %s1387_s1 = inlined_call_operand.hbm [shape: s32[2,2,128], index: 1, kind: input, shape index: {}]   ;;  %s1388_s2 = inlined_call_operand.hbm [shape: f32[2,4,2,128], index: 2, kind: output, shape index: {0}]   ;;  %s1389_s3 = inlined_call_operand.hbm [shape: f32[2,4,2,128], index: 3, kind: output, shape index: {1}]   ;;  %s1390_s4 = inlined_call_operand.hbm [shape: f32[2,4,2,128], index: 4, kind: output, shape index: {2}]  }
   0x1   :  { %1394 = sst [smem:[#allocation15_spill]] %s1386_s0 }
   0x2   :  { %10 = vsyncpa [#allocation3], 0 }
   0x3   :  { %12 = vsyncpa [#allocation3 + $0x1], 0 }
   0x4   :  { %13 = vsyncpa [#allocation6], 0 }
   0x5   :  { %15 = vsyncpa [#allocation6 + $0x1], 0 }
   0x6   :  { %16 = vsyncpa [#allocation4], 0 }
   0x7   :  { %18 = vsyncpa [#allocation4 + $0x1], 0 }
   0x8   :  { %19 = vsyncpa [#allocation9], 0 }
   0x9   :  { %21 = vsyncpa [#allocation9 + $0x1], 0  ;;  %s1021_s15 = smov 0   ;;  %s1023_s16 = smov 0  }
   0xa   :  { %s1025_s17 = smov 0   ;;  %s1027_s18 = smov 0  }
   0xb   :  { %s1029_s19 = smov 0   ;;  %s1031_s20 = smov 0  }
   0xc LB: > { %s1052_s21 = sadd.s32 4294967295, %s984_s20   ;;  %s1392_s22 = sadd.s32 4294967294, %s984_s20   ;;  %s984_s20 = sphi %s1031_s20, %s27_s20   ;;  %s980_s19 = sphi %s1029_s19, %s1413_s19   ;;  %s976_s18 = sphi %s1027_s18, %s1412_s18   ;;  %s972_s17 = sphi %s1025_s17, %s1411_s17   ;;  %s968_s16 = sphi %s1023_s16, %s1410_s16   ;;  %s964_s15 = sphi %s1021_s15, %s1409_s15  }
   0xd   : > { %s46_s23 = sadd.s32 1, %s980_s19  ;;  %s57_s24 = sadd.s32 1, %s972_s17 }
   0xe   : > { %p48_p0 = scmp.ge.s32.totalorder %s46_s23, 2  ;;  %p64_p1 = scmp.ne.s32.totalorder %s972_s17, %s968_s16 }
   0xf   : > { %p65_p2 = scmp.eq.s32.totalorder %s984_s20, 0  ;;  %p70_p3 = scmp.ne.s32.totalorder %s968_s16, %s964_s15 }
  0x10   : > { %s1415_s23 = smov (%p48_p0, %s46_s23), 0  ;;  %p71_p5 = scmp.eq.s32.totalorder %s1052_s21, 0 }
  0x11   : > { %p1064_p4 = por %p65_p2, %p64_p1  ;;  %s52_s26 = ssub.s32 %s980_s19, %s1415_s23 }
  0x12   : > { %p126_p6 = scmp.eq.s32.totalorder %s1052_s21, 1  ;;  %p55_p7 = scmp.eq.s32.totalorder %s52_s26, 0 }
  0x13   : > { %p1072_p8 = por %p71_p5, %p70_p3  ;;  %p132_p10 = scmp.eq.s32.totalorder %s1392_s22, 1 }
  0x14   : > { %p1076_p9 = por %p126_p6, %p64_p1  ;;  %p723_p13 = scmp.lt.s32.totalorder %s984_s20, 2 }
  0x15   : > { %s1396_s27 = scalar_select %p1072_p8, 1, 0 }
  0x16   : > { %s1397_s28 = scalar_select %p1076_p9, 1, 0 }
  0x17   : > { %s1083_s29 = scalar_select %p55_p7, %s972_s17, %s57_s24  }
  0x18   : > { %p1085_p11 = por %p132_p10, %p70_p3  ;;  %s1092_s5 = sand.u32 1, %s972_s17  }
  0x19   : > { %s649_s6 = sshll.u32 %s1092_s5, 3  ;;  %s692_s7 = sshll.u32 %s980_s19, 7 }
  0x1a   : > { %s1398_s30 = scalar_select %p1085_p11, 1, 0 }
  0x1b   : > { %s1399_s0 = sld [smem:[#allocation15_spill]]  ;;  %s212_s11 = scalar_lea.vmem [#allocation2], %s649_s6 }
  0x1c   : > { %s221_s12 = sshll.u32 %s212_s11, 4  ;;  %p1105_p0 = pnand %p723_p13, %p1064_p4  ;;  %s1101_s12 = int_to_ptr.vmem [resolvable:$true] %s221_s12 }
  0x1d   : > { %s209_s14 = scalar_lea.sflag [#allocation3], %s1092_s5 }
  0x1e   : > { %p780_p3 = pneg %p1105_p0 }
  0x21   : > { %s1099_s10 = scalar_lea.hbm %s1399_s0, %s692_s7  ;;  %s783_s25 = scalar_lea.hbm %s1399_s0, 256 }
  0x22   : > { %s778_s24 = scalar_lea.hbm %s1099_s10, 128  ;;  %p784_p4 = scmp.lt.u32.totalorder %s1099_s10, %s1399_s0 }
  0x23   : > { %p779_p2 = scmp.ne.s32.totalorder %s1099_s10, %s778_s24  ;;  %p785_p7 = scmp.lt.u32.totalorder %s783_s25, %s778_s24 }
  0x24   : > { %p787_p13 = scmp.lt.u32.totalorder %s778_s24, %s1099_s10 }
  0x25   : > { %p781_p5 = pnand %p780_p3, %p779_p2  ;;  %p786_p10 = por %p785_p7, %p784_p4 }
  0x27   : > { %p782_p6 = pneg %p781_p5  ;;  %p788_p12 = por %p787_p13, %p786_p10 }
  0x29   : > { %p789_p1 = pnand %p788_p12, %p782_p6 }
  0x2b   : > { %792 = shalt.err (!%p789_p1)
}
  0x2c   : > { %s793_s9 = scalar_lea.vmem %s1101_s12, 128  ;;  %s986_s11 = smov [#allocation2]  }
  0x2d   : > { %p794_p2 = scmp.ne.s32.totalorder %s1101_s12, %s793_s9  ;;  %s798_s26 = sshll.u32 %s986_s11, 4  ;;  %s799_s26 = int_to_ptr.vmem [resolvable:$false] %s798_s26 }
  0x2e   : > { %s800_s6 = scalar_lea.vmem %s799_s26, 256  ;;  %p801_p9 = scmp.lt.s32.totalorder %s1101_s12, %s799_s26 }
  0x2f   : > { %p796_p5 = pnand %p794_p2, %p780_p3  ;;  %p802_p4 = scmp.lt.s32.totalorder %s800_s6, %s793_s9 }
  0x31   : > { %p797_p11 = pneg %p796_p5  ;;  %p803_p7 = por %p802_p4, %p801_p9 }
  0x33   : > { %p804_p10 = pnand %p803_p7, %p797_p11 }
  0x35   : > { %807 = shalt.err (!%p804_p10)
}
  0x36   : > { %s987_s24 = smov 32   ;;  %s988_s25 = smov 2  }
  0x37   : > { %709 = dma.hbm_to_vmem [thread:$0]  (!%p1105_p0), %s1099_s10, 128, %s1101_s12, %s209_s14, %s987_s24, %s987_s24, %s988_s25  }
  0x38   : > { %p249_p12 = scmp.lt.s32.totalorder %s984_s20, 3  ;;  %s652_s7 = sshll.u32 %s1092_s5, 1 }
  0x39   : > { %s653_s8 = sshll.u32 %s980_s19, 5  ;;  %p1401_p9 = scmp.ge.s32.totalorder %s984_s20, 1 }
  0x3a   : > { %s1150_s6 = scalar_lea.hbm %s1387_s1, %s653_s8  ;;  %s235_s22 = scalar_lea.vmem [#allocation5], %s652_s7 }
  0x3b   : > { %p1143_p11 = pnand %p1401_p9, %p249_p12  ;;  %s244_s0 = sshll.u32 %s235_s22, 4  ;;  %s245_s0 = int_to_ptr.vmem [resolvable:$true] %s244_s0 }
  0x3c   : > { %s232_s10 = scalar_lea.sflag [#allocation6], %s1092_s5  ;;  %s808_s12 = scalar_lea.hbm %s1150_s6, 32 }
  0x3d   : > { %s1402_s9 = scalar_select %p1143_p11, 1, 0 }
  0x3e   : > { %p809_p1 = scmp.ne.s32.totalorder %s1150_s6, %s808_s12  ;;  %s813_s25 = scalar_lea.hbm %s1387_s1, 64 }
  0x3f   : > { %p814_p2 = scmp.lt.u32.totalorder %s1150_s6, %s1387_s1  ;;  %p815_p5 = scmp.lt.u32.totalorder %s813_s25, %s808_s12 }
  0x40   : > { %p811_p6 = pnand %p809_p1, %p780_p3  ;;  %p817_p7 = scmp.lt.u32.totalorder %s808_s12, %s1150_s6 }
  0x41   : > { %p816_p4 = por %p815_p5, %p814_p2 }
  0x42   : > { %p812_p13 = pneg %p811_p6 }
  0x43   : > { %p818_p10 = por %p817_p7, %p816_p4 }
  0x45   : > { %p819_p12 = pnand %p818_p10, %p812_p13 }
  0x47   : > { %822 = shalt.err (!%p819_p12)
}
  0x48   : > { %s823_s22 = scalar_lea.vmem %s245_s0, 32  ;;  %s989_s5 = smov [#allocation5]  }
  0x49   : > { %p824_p9 = scmp.ne.s32.totalorder %s245_s0, %s823_s22  ;;  %s828_s7 = sshll.u32 %s989_s5, 4  ;;  %s829_s7 = int_to_ptr.vmem [resolvable:$false] %s828_s7 }
  0x4a   : > { %s830_s26 = scalar_lea.vmem %s829_s7, 64  ;;  %p831_p8 = scmp.lt.s32.totalorder %s245_s0, %s829_s7 }
  0x4b   : > { %p826_p1 = pnand %p824_p9, %p780_p3  ;;  %p832_p11 = scmp.lt.s32.totalorder %s830_s26, %s823_s22 }
  0x4d   : > { %p827_p6 = pneg %p826_p1  ;;  %p833_p2 = por %p832_p11, %p831_p8 }
  0x4f   : > { %p834_p5 = pnand %p833_p2, %p827_p6 }
  0x51   : > { %837 = shalt.err (!%p834_p5)
}
  0x52   : > { %712 = dma.hbm_to_vmem [thread:$0]  (!%p1105_p0), %s1150_s6, 32, %s245_s0, %s232_s10  }
  0x53   : > { %p1403_p13 = scmp.ne.s32.totalorder %s1402_s9, 0 }
  0x54   : > { %s1175_s12 = sand.u32 (!%p1403_p13), 1, %s968_s16   ;;  %p1404_p8 = scmp.ne.s32.totalorder (!%p1403_p13), %s1396_s27, 0 }
  0x55   : > { %253 = sbr.rel (%p1403_p13) target bundleno = 178 (0xb2), region = 28  ;;  %s655_s14 = sshll.u32 (!%p1403_p13), %s1175_s12, 3 }
  0x56   : > { %s256_s24 = scalar_lea.sflag (!%p1403_p13), [#allocation3], %s1175_s12  ;;  %s1179_s25 = scalar_lea.vmem (!%p1403_p13), [#allocation2], %s655_s14 }
  0x5c   : > { %947 = dma.done.wait (%p1404_p8), %s256_s24, 128  }
  0x5d   : > { %949 = vsyncadd (%p1404_p8), %s256_s24, 4294967168  ;;  %s656_s0 = sshll.u32 %s1175_s12, 1  ;;  %s265_s13 = scalar_lea.sflag [#allocation6], %s1175_s12 }
  0x5e   : > { %s268_s9 = scalar_lea.vmem [#allocation5], %s656_s0 }
  0x5f   : > { %951 = dma.done.wait (%p1404_p8), %s265_s13, 32  }
  0x60   : > { %953 = vsyncadd (%p1404_p8), %s265_s13, 4294967264  ;;  %s1191_s6 = scalar_lea.vmem [#allocation8], %s655_s14  ;;  %v990_v0 = vmov 0.0   ;;  %s1197_s10 = scalar_lea.vmem [#allocation7], %s655_s14  ;;  %v329_v1 = vld [vmem:[%s268_s9] sm:$0x3] }
  0x61   : > { %321 = vst [vmem:[%s1191_s6] sm:$0x3] %v990_v0  ;;  %322 = vst [vmem:[%s1191_s6 + $0x2] sm:$0x3] %v990_v0  ;;  %s415_s27 = sand.u32 1, %s1052_s21   ;;  %s1204_s8 = scalar_lea.vmem [#allocation10], %s655_s14  ;;  %vm331_vm0 = vcmp.eq.s32.totalorder %v329_v1, 0 }
  0x62   : > { %323 = vst [vmem:[%s1191_s6 + $0x4] sm:$0x3] %v990_v0  ;;  %324 = vst [vmem:[%s1191_s6 + $0x6] sm:$0x3] %v990_v0  ;;  %s1211_s11 = sshll.u32 %s976_s18, 7  ;;  %s452_s22 = sshll.u32 %s1191_s6, 4  ;;  %s1242_s22 = int_to_ptr.vmem [resolvable:$true] %s452_s22 }
  0x63   : > { %317 = vst [vmem:[%s1197_s10] sm:$0x3] %v990_v0  ;;  %318 = vst [vmem:[%s1197_s10 + $0x2] sm:$0x3] %v990_v0  ;;  %v330_v2 = vld [vmem:[%s1179_s25] sm:$0x3]  ;;  %vm349_vm1 = vcmp.eq.s32.totalorder %v329_v1, 1  ;;  %s1238_s7 = scalar_lea.hbm %s1389_s3, %s1211_s11  ;;  %s1253_s24 = scalar_lea.hbm %s1388_s2, %s1211_s11 }
  0x64   : > { %319 = vst [vmem:[%s1197_s10 + $0x4] sm:$0x3] %v990_v0  ;;  %320 = vst [vmem:[%s1197_s10 + $0x6] sm:$0x3] %v990_v0  ;;  %v660_v3 = vld [vmem:[%s1179_s25 + $0x2] sm:$0x3]  ;;  %v343_v6 = vmul.f32 %v330_v2, %v330_v2 }
  0x65   : > { %325 = vst [vmem:[%s1204_s8] sm:$0x3] %v990_v0  ;;  %326 = vst [vmem:[%s1204_s8 + $0x2] sm:$0x3] %v990_v0  ;;  %v364_v7 = vmul.f32 %v660_v3, %v660_v3  ;;  %v333_v8 = vsel %vm331_vm0, 1.0, %v990_v0  ;;  %v351_v9 = vsel %vm349_vm1, 1.0, %v990_v0  ;;  %vm370_vm2 = vcmp.eq.s32.totalorder %v329_v1, 2 }
  0x66   : > { %327 = vst [vmem:[%s1204_s8 + $0x4] sm:$0x3] %v990_v0  ;;  %328 = vst [vmem:[%s1204_s8 + $0x6] sm:$0x3] %v990_v0  ;;  %vm391_vm3 = vcmp.eq.s32.totalorder %v329_v1, 3  ;;  %v372_v13 = vsel %vm370_vm2, 1.0, %v990_v0 }
  0x67   : > { %v393_v14 = vsel %vm391_vm3, 1.0, %v990_v0  ;;  %v332_v19 = vsel %vm331_vm0, %v330_v2, 0.0  ;;  %v350_v21 = vsel %vm349_vm1, %v660_v3, 0.0  ;;  %v667_v27 = vld [vmem:[%s1179_s25 + $0x4] sm:$0x3]  ;;  %s435_s0 = sshll.u32 %s1197_s10, 4  ;;  %s1262_s0 = int_to_ptr.vmem [resolvable:$true] %s435_s0 }
  0x68   : > { %v338_v4 = vld [vmem:[%s1191_s6] sm:$0x3]  ;;  %v663_v5 = vld [vmem:[%s1191_s6 + $0x2] sm:$0x3]  ;;  %v371_v30 = vsel %vm370_vm2, %v667_v27, 0.0  ;;  %v385_v32 = vmul.f32 %v667_v27, %v667_v27  ;;  %s1268_s13 = scalar_lea.sflag [#allocation9], %s415_s27 }
  0x69   : > { %v670_v10 = vld [vmem:[%s1191_s6 + $0x4] sm:$0x3]  ;;  %v340_v11 = vadd.f32 %v338_v4, %v333_v8  ;;  %v360_v12 = vadd.f32 %v663_v5, %v351_v9  ;;  %v677_v15 = vld [vmem:[%s1191_s6 + $0x6] sm:$0x3]  ;;  %v674_v33 = vld [vmem:[%s1179_s25 + $0x6] sm:$0x3] }
  0x6a   : > { %v334_v16 = vld [vmem:[%s1197_s10] sm:$0x3]  ;;  %v381_v17 = vadd.f32 %v670_v10, %v372_v13  ;;  %v402_v18 = vadd.f32 %v677_v15, %v393_v14  ;;  %v661_v22 = vld [vmem:[%s1197_s10 + $0x2] sm:$0x3]  ;;  %v392_v35 = vsel %vm391_vm3, %v674_v33, 0.0  ;;  %v406_v38 = vmul.f32 %v674_v33, %v674_v33  ;;  %s469_s25 = sshll.u32 %s1204_s8, 4  ;;  %s1304_s25 = int_to_ptr.vmem [resolvable:$true] %s469_s25 }
  0x6b   : > { %341 = vst [vmem:[%s1191_s6] sm:$0x3] %v340_v11  ;;  %664 = vst [vmem:[%s1191_s6 + $0x2] sm:$0x3] %v360_v12  ;;  %v336_v23 = vadd.f32 %v334_v16, %v332_v19  ;;  %v355_v25 = vadd.f32 %v661_v22, %v350_v21  ;;  %v668_v28 = vld [vmem:[%s1197_s10 + $0x4] sm:$0x3]  ;;  %s838_s9 = scalar_lea.vmem %s1242_s22, 128 }
  0x6c   : > { %v342_v20 = vld [vmem:[%s1204_s8] sm:$0x3]  ;;  %v665_v26 = vld [vmem:[%s1204_s8 + $0x2] sm:$0x3]  ;;  %671 = vst [vmem:[%s1191_s6 + $0x4] sm:$0x3] %v381_v17  ;;  %v376_v34 = vadd.f32 %v668_v28, %v371_v30  ;;  %p839_p0 = scmp.ne.s32.totalorder %s1242_s22, %s838_s9 }
  0x6d   : > { %v345_v24 = vadd.f32 %v343_v6, %v342_v20  ;;  %678 = vst [vmem:[%s1191_s6 + $0x6] sm:$0x3] %v402_v18  ;;  %v366_v29 = vadd.f32 %v665_v26, %v364_v7  ;;  %v672_v31 = vld [vmem:[%s1204_s8 + $0x4] sm:$0x3]  ;;  %337 = vst [vmem:[%s1197_s10] sm:$0x3] %v336_v23  ;;  %p1405_p3 = scmp.ne.s32.totalorder %s1397_s28, 0 }
  0x6e   : > { %662 = vst [vmem:[%s1197_s10 + $0x2] sm:$0x3] %v355_v25  ;;  %v675_v36 = vld [vmem:[%s1197_s10 + $0x6] sm:$0x3]  ;;  %v387_v39 = vadd.f32 %v672_v31, %v385_v32  ;;  %s991_s6 = smov [#allocation8]  }
  0x6f   : > { %346 = vst [vmem:[%s1204_s8] sm:$0x3] %v345_v24  ;;  %v679_v37 = vld [vmem:[%s1204_s8 + $0x6] sm:$0x3]  ;;  %666 = vst [vmem:[%s1204_s8 + $0x2] sm:$0x3] %v366_v29  ;;  %v397_v40 = vadd.f32 %v675_v36, %v392_v35  ;;  %p840_p11 = pnand %p839_p0, %p1405_p3  ;;  %s842_s18 = sshll.u32 %s991_s6, 4  ;;  %s843_s18 = int_to_ptr.vmem [resolvable:$false] %s842_s18 }
  0x70   : > { %s844_s5 = scalar_lea.vmem %s843_s18, 256  ;;  %p845_p7 = scmp.lt.s32.totalorder %s1242_s22, %s843_s18 }
  0x71   : > { %p841_p4 = pneg %p840_p11  ;;  %p846_p10 = scmp.lt.s32.totalorder %s844_s5, %s838_s9 }
  0x73   : > { %p847_p12 = por %p846_p10, %p845_p7 }
  0x75   : > { %p848_p9 = pnand %p847_p12, %p841_p4 }
  0x77   : > { %851 = shalt.err (!%p848_p9)
}
  0x78   : > { %s852_s21 = scalar_lea.hbm %s1238_s7, 128  ;;  %s856_s14 = scalar_lea.hbm %s1389_s3, 256 }
  0x79   : > { %p853_p1 = scmp.ne.s32.totalorder %s1238_s7, %s852_s21  ;;  %p857_p5 = scmp.lt.u32.totalorder %s1238_s7, %s1389_s3 }
  0x7a   : > { %p858_p13 = scmp.lt.u32.totalorder %s856_s14, %s852_s21  ;;  %p860_p0 = scmp.lt.u32.totalorder %s852_s21, %s1238_s7 }
  0x7b   : > { %p854_p6 = pnand %p853_p1, %p1405_p3 }
  0x7c   : > { %p859_p8 = por %p858_p13, %p857_p5 }
  0x7d   : > { %p855_p2 = pneg %p854_p6 }
  0x7e   : > { %p861_p11 = por %p860_p0, %p859_p8 }
  0x80   : > { %p862_p4 = pnand %p861_p11, %p855_p2 }
  0x82   : > { %865 = shalt.err (!%p862_p4)
}
  0x83   : > { %s992_s9 = smov 32   ;;  %s993_s5 = smov 2   ;;  %669 = vst [vmem:[%s1197_s10 + $0x4] sm:$0x3] %v376_v34  ;;  %v408_v41 = vadd.f32 %v679_v37, %v406_v38  ;;  %673 = vst [vmem:[%s1204_s8 + $0x4] sm:$0x3] %v387_v39 }
  0x84   : > { %701 = dma.vmem_to_hbm [thread:$0]  (%p1405_p3), %s1242_s22, 128, %s1238_s7, %s1268_s13, %s992_s9, %s992_s9, %s993_s5  }
  0x85   : > { %s1300_s26 = scalar_lea.hbm %s1390_s4, %s1211_s11  ;;  %676 = vst [vmem:[%s1197_s10 + $0x6] sm:$0x3] %v397_v40  ;;  %680 = vst [vmem:[%s1204_s8 + $0x6] sm:$0x3] %v408_v41  ;;  %s411_s14 = scalar_lea.sflag [#allocation4], %s1175_s12 }
  0x86   : > { %s866_s6 = scalar_lea.vmem %s1262_s0, 128  ;;  %s994_s22 = smov [#allocation7]  }
  0x87   : > { %p867_p7 = scmp.ne.s32.totalorder %s1262_s0, %s866_s6  ;;  %s870_s7 = sshll.u32 %s994_s22, 4  ;;  %s871_s7 = int_to_ptr.vmem [resolvable:$false] %s870_s7 }
  0x88   : > { %s872_s18 = scalar_lea.vmem %s871_s7, 256  ;;  %p873_p9 = scmp.lt.s32.totalorder %s1262_s0, %s871_s7 }
  0x89   : > { %p868_p10 = pnand %p867_p7, %p1405_p3  ;;  %p874_p1 = scmp.lt.s32.totalorder %s872_s18, %s866_s6 }
  0x8b   : > { %p869_p12 = pneg %p868_p10  ;;  %p875_p6 = por %p874_p1, %p873_p9 }
  0x8d   : > { %p876_p2 = pnand %p875_p6, %p869_p12 }
  0x8f   : > { %879 = shalt.err (!%p876_p2)
}
  0x90   : > { %s880_s10 = scalar_lea.hbm %s1253_s24, 128  ;;  %s884_s21 = scalar_lea.hbm %s1388_s2, 256 }
  0x91   : > { %p881_p5 = scmp.ne.s32.totalorder %s1253_s24, %s880_s10  ;;  %p885_p0 = scmp.lt.u32.totalorder %s1253_s24, %s1388_s2 }
  0x92   : > { %p886_p11 = scmp.lt.u32.totalorder %s884_s21, %s880_s10  ;;  %p888_p7 = scmp.lt.u32.totalorder %s880_s10, %s1253_s24 }
  0x93   : > { %p882_p13 = pnand %p881_p5, %p1405_p3 }
  0x94   : > { %p887_p4 = por %p886_p11, %p885_p0 }
  0x95   : > { %p883_p8 = pneg %p882_p13 }
  0x96   : > { %p889_p10 = por %p888_p7, %p887_p4 }
  0x98   : > { %p890_p12 = pnand %p889_p10, %p883_p8 }
  0x9a   : > { %893 = shalt.err (!%p890_p12)
}
  0x9b   : > { %700 = dma.vmem_to_hbm [thread:$0]  (%p1405_p3), %s1262_s0, 128, %s1253_s24, %s411_s14, %s992_s9, %s992_s9, %s993_s5  }
  0x9c   : > { %s894_s6 = scalar_lea.vmem %s1304_s25, 128  ;;  %s995_s7 = smov [#allocation10]  }
  0x9d   : > { %p895_p9 = scmp.ne.s32.totalorder %s1304_s25, %s894_s6  ;;  %s898_s18 = sshll.u32 %s995_s7, 4  ;;  %s899_s18 = int_to_ptr.vmem [resolvable:$false] %s898_s18 }
  0x9e   : > { %s900_s10 = scalar_lea.vmem %s899_s18, 256  ;;  %p901_p2 = scmp.lt.s32.totalorder %s1304_s25, %s899_s18 }
  0x9f   : > { %p896_p1 = pnand %p895_p9, %p1405_p3  ;;  %p902_p5 = scmp.lt.s32.totalorder %s900_s10, %s894_s6 }
  0xa1   : > { %p897_p6 = pneg %p896_p1  ;;  %p903_p13 = por %p902_p5, %p901_p2 }
  0xa3   : > { %p904_p8 = pnand %p903_p13, %p897_p6 }
  0xa5   : > { %907 = shalt.err (!%p904_p8)
}
  0xa6   : > { %s908_s12 = scalar_lea.hbm %s1300_s26, 128  ;;  %s912_s14 = scalar_lea.hbm %s1390_s4, 256 }
  0xa7   : > { %p909_p0 = scmp.ne.s32.totalorder %s1300_s26, %s908_s12  ;;  %p913_p7 = scmp.lt.u32.totalorder %s1300_s26, %s1390_s4 }
  0xa8   : > { %p914_p10 = scmp.lt.u32.totalorder %s912_s14, %s908_s12  ;;  %p916_p9 = scmp.lt.u32.totalorder %s908_s12, %s1300_s26 }
  0xa9   : > { %p910_p11 = pnand %p909_p0, %p1405_p3 }
  0xaa   : > { %p915_p12 = por %p914_p10, %p913_p7 }
  0xab   : > { %p911_p4 = pneg %p910_p11 }
  0xac   : > { %p917_p1 = por %p916_p9, %p915_p12 }
  0xae   : > { %p918_p6 = pnand %p917_p1, %p911_p4 }
  0xb0   : > { %921 = shalt.err (!%p918_p6)
}
  0xb1   : > { %702 = dma.vmem_to_hbm [thread:$0]  (%p1405_p3), %s1304_s25, 128, %s1300_s26, %s1268_s13, %s992_s9, %s992_s9, %s993_s5  }
  0xb2 PF: > { %s484_s21 = sand.u32 1, %s964_s15   ;;  %p1406_p2 = scmp.ne.s32.totalorder %s1398_s30, 0 }
  0xb3   : > { %p1407_p5 = scmp.ge.s32.totalorder %s984_s20, 2  ;;  %s485_s27 = scalar_lea.sflag [#allocation4], %s484_s21 }
  0xb5   : > { %p714_p13 = pnand %p1407_p5, %p1406_p2 }
  0xb7   : > { %955 = dma.done.wait (!%p714_p13), %s485_s27, 128  }
  0xb8   : > { %957 = vsyncadd (!%p714_p13), %s485_s27, 4294967168  ;;  %s1408_s28 = sadd.s32 4294967294, %s984_s20  }
  0xb9   : > { %s493_s22 = sand.u32 1, %s1408_s28  }
  0xba   : > { %s494_s6 = scalar_lea.sflag [#allocation9], %s493_s22 }
  0xbb   : > { %959 = dma.done.wait (!%p714_p13), %s494_s6, 256  }
  0xbc   : > { %961 = vsyncadd (!%p714_p13), %s494_s6, 4294967040  ;;  %s27_s20 = sadd.s32 1, %s984_s20   ;;  %s1409_s15 = smov %s968_s16 }
  0xbd   : > { %p24_p3 = scmp.ge.s32.totalorder %s27_s20, 4   ;;  %s1410_s16 = smov %s972_s17 }
  0xbe   : > { %s1411_s17 = smov %s1083_s29  ;;  %s1412_s18 = smov %s980_s19 }
  0xbf   : > { %s1413_s19 = smov %s1415_s23  ;;  %26 = sbr.rel (!%p24_p3) target bundleno = 12 (0xc), region = 134 }
  0xc6   :  { %508 = vsyncpa [#allocation3], 1 }
  0xc7   :  { %510 = vsyncpa [#allocation3 + $0x1], 1 }
  0xc8   :  { %511 = vsyncpa [#allocation6], 1 }
  0xc9   :  { %513 = vsyncpa [#allocation6 + $0x1], 1 }
  0xca   :  { %514 = vsyncpa [#allocation4], 1 }
  0xcb   :  { %516 = vsyncpa [#allocation4 + $0x1], 1 }
  0xcc   :  { %517 = vsyncpa [#allocation9], 1 }
  0xcd   :  { %519 = vsyncpa [#allocation9 + $0x1], 1 }

</bundles_post_ra>
